<compile_context>
chip_gen: v5e
topology: v5e:2x2
jax: 0.10.0
libtpu: 0.0.40
codegen_flags: <defaults>
</compile_context>

<pallas_src>
import functools
import math

import jax
import jax.numpy as jnp
from jax.experimental import pallas as pl
from jax.experimental.pallas import tpu as pltpu

# Plain Python float (kernels must not close over concrete jax arrays).
_NEG_BIG = -1e30  # finite stand-in for -inf: exp() underflows to exactly 0.


def _round_up(x, m):
    return ((x + m - 1) // m) * m


def _fold_lanes(x):
    """(R, C) -> (R, 128) by summing 128-lane slabs. VALU adds only (no XLU)."""
    nb = x.shape[-1] // 128
    out = x[:, 0:128]
    for j in range(1, nb):
        out = out + x[:, j * 128:(j + 1) * 128]
    return out


def _firm_v2_kernel(f_r_ref, f_c_ref, inl_r_ref, inl_c_ref, out_ref,
                    l_acc, a_acc, ca_acc, b_acc,
                    *, true_n, tile_r, tile_c, m_static):
    r = pl.program_id(0)            # row-tile index   ("parallel")
    c = pl.program_id(1)            # col-tile index   (reduction, "arbitrary")
    half = true_n // 2

    rlo = r * tile_r
    rhi = rlo + tile_r
    clo = c * tile_c
    chi = clo + tile_c

    @pl.when(c == 0)
    def _init():
        l_acc[...] = jnp.zeros_like(l_acc)      # sum_j exp(logits - m)  (lane-blocked)
        a_acc[...] = jnp.zeros_like(a_acc)      # sum_j inl_c_j * sim_ij (lane-blocked)
        ca_acc[...] = jnp.zeros_like(ca_acc)    # sum_j inl_c_j          (per row)
        b_acc[...] = jnp.zeros_like(b_acc)      # sim at the paired column (per row)

    # cos_similarity / tau: 1/tau is pre-folded into the (bf16) features, the
    # column block is pre-transposed -> canonical (M,K)x(K,N) MXU matmul, f32 acc.
    sim = jnp.dot(f_r_ref[...], f_c_ref[...], preferred_element_type=jnp.float32)

    inl_c = inl_c_ref[...]                      # (1, tile_c) f32 in {0,1}

    # Scalar tile predicates: does this tile touch the diagonal / paired band /
    # padded columns?  (Conservative for the paired band - extra slow tiles ok.)
    diag_hit = (rlo < chi) & (clo < rhi)
    pair_hit = ((rlo + half < chi) & (clo < rhi + half)) | \
               ((rlo - half < chi) & (clo < rhi - half))
    pad_hit = chi > true_n
    on_band = diag_hit | pair_hit | pad_hit

    @pl.when(jnp.logical_not(on_band))
    def _fast():
        # Off-band: no diagonal, no paired column, no padding in this tile.
        # logits == sim; inlier-row mask == inl_c (row factor applied at finalize).
        l_acc[...] += _fold_lanes(jnp.exp(sim - m_static))
        a_acc[...] += _fold_lanes(inl_c * sim)
        ca_acc[...] += jnp.sum(inl_c, axis=1, keepdims=True)   # (1,1) broadcast add

    @pl.when(on_band)
    def _slow():
        row_ids = rlo + jax.lax.broadcasted_iota(jnp.int32, (tile_r, 1), 0)
        col_ids = clo + jax.lax.broadcasted_iota(jnp.int32, (1, tile_c), 1)
        diag = row_ids == col_ids
        col_valid = col_ids < true_n
        kill = diag | jnp.logical_not(col_valid)

        logits = jnp.where(kill, _NEG_BIG, sim)
        l_acc[...] += _fold_lanes(jnp.exp(logits - m_static))

        keep = jnp.logical_not(kill).astype(jnp.float32)       # valid & off-diagonal
        sim_keep = jnp.where(kill, 0.0, sim)
        a_acc[...] += _fold_lanes(inl_c * sim_keep)
        ca_acc[...] += jnp.sum(inl_c * keep, axis=1, keepdims=True)

        # eye(N).roll(N//2, dims=0): row i pairs with column (i + N/2) mod N.
        paired_col = jnp.where(row_ids < half, row_ids + half, row_ids - half)
        paired = ((paired_col == col_ids) & col_valid).astype(jnp.float32)
        b_acc[...] += jnp.sum(paired * sim_keep, axis=1, keepdims=True)

    @pl.when(c == pl.num_programs(1) - 1)
    def _finalize():
        row_ids = rlo + jax.lax.broadcasted_iota(jnp.int32, (tile_r, 1), 0)
        row_valid = (row_ids < true_n).astype(jnp.float32)

        # Single cross-lane reduce per row tile (deferred out of the hot loop).
        lse = m_static + jnp.log(jnp.sum(l_acc[...], axis=1, keepdims=True))
        a_row = jnp.sum(a_acc[...], axis=1, keepdims=True)

        inl_r = inl_r_ref[...]                                  # (tile_r, 1) in {0,1}
        # inlier rows: mask_j = inl_c_j (diag excluded); outlier rows: mask_j = paired.
        s_row = inl_r * a_row + (1.0 - inl_r) * b_acc[...]
        # every real row has exactly one valid off-diagonal paired column -> count 1.
        cnt = inl_r * ca_acc[...] + (1.0 - inl_r)
        denom = jnp.maximum(cnt, 1.0)                           # exact divide (no approx)
        row_loss = -(s_row - cnt * lse) / denom * row_valid

        partial = jnp.sum(row_loss, axis=0, keepdims=True)      # (1, 1)
        out_ref[...] = jnp.broadcast_to(partial, out_ref.shape)  # lane-dense (1, 128)


def firm_loss_v2(f1, f2, labels, *, tau=0.2, inlier_label=1,
                 tile_r=512, tile_c=1024, compute_dtype=jnp.bfloat16):
    """JAX/Pallas equivalent of FIRMLossv2.forward (features assumed L2-normalized).

    Note: the static softmax max (1/tau) relies on normalized features; if they
    are not normalized the loss may overflow to inf (never silently wrong).
    Set compute_dtype=jnp.float32 for near-exact parity with the f32 reference.
    """
    f1 = jnp.asarray(f1, jnp.float32)
    f2 = jnp.asarray(f2, jnp.float32)
    labels = jnp.asarray(labels)
    b, d = f1.shape
    n = 2 * b

    # Clamp tiles to the problem; keep >= 2 row tiles when possible so the
    # "parallel" row axis spans both v7x TensorCores.
    tile_r = max(16, min(tile_r, _round_up((n + 1) // 2, 16)))
    tile_c = max(128, min(tile_c, _round_up(n, 128)))
    assert tile_r % 16 == 0 and tile_c % 128 == 0, "tiles must be (sublane, lane) aligned"

    # Fold 1/tau into both matmul operands: (f/sqrt(tau)) @ (f/sqrt(tau)).T == (f@f.T)/tau
    scale = 1.0 / math.sqrt(float(tau))
    features = jnp.concatenate([f1, f2], axis=0) * scale                      # (N, D) f32
    inlier = (jnp.concatenate([labels, labels], axis=0) == inlier_label).astype(jnp.float32)

    # Pad D to a lane multiple (zero columns are neutral for the dot product),
    # pad rows / cols independently (no lcm blow-up), pre-transpose the column
    # operand once so the in-kernel matmul is canonical (M,K)x(K,N).
    d_pad = _round_up(d, 128)
    n_r = _round_up(n, tile_r)
    n_c = _round_up(n, tile_c)
    feat = jnp.pad(features, ((0, 0), (0, d_pad - d)))
    feat_rows = jnp.pad(feat, ((0, n_r - n), (0, 0))).astype(compute_dtype)   # (n_r, d_pad)
    feat_cols = jnp.pad(feat, ((0, n_c - n), (0, 0))).astype(compute_dtype).T  # (d_pad, n_c)
    inl_rows = jnp.pad(inlier, (0, n_r - n)).reshape(n_r, 1)
    inl_cols = jnp.pad(inlier, (0, n_c - n)).reshape(1, n_c)
    # TODO(synk): for very large D, add a third grid axis over the feature dim
    # instead of streaming the full (d_pad, tile_c) column block each step.

    num_r = n_r // tile_r
    num_c = n_c // tile_c

    kernel = functools.partial(_firm_v2_kernel, true_n=n, tile_r=tile_r,
                               tile_c=tile_c, m_static=1.0 / float(tau))

    partials = pl.pallas_call(
        kernel,
        out_shape=jax.ShapeDtypeStruct((num_r, 1, 128), jnp.float32),
        grid=(num_r, num_c),
        in_specs=[
            pl.BlockSpec((tile_r, d_pad), lambda r, c: (r, 0)),   # row features
            pl.BlockSpec((d_pad, tile_c), lambda r, c: (0, c)),   # col features (pre-T)
            pl.BlockSpec((tile_r, 1), lambda r, c: (r, 0)),       # inlier flags (rows)
            pl.BlockSpec((1, tile_c), lambda r, c: (0, c)),       # inlier flags (cols)
        ],
        out_specs=pl.BlockSpec((None, 1, 128), lambda r, c: (r, 0, 0)),
        scratch_shapes=[
            pltpu.VMEM((tile_r, 128), jnp.float32),   # l_acc (lane-blocked sum-exp)
            pltpu.VMEM((tile_r, 128), jnp.float32),   # a_acc (lane-blocked inl_c*sim)
            pltpu.VMEM((tile_r, 1), jnp.float32),     # ca_acc (inlier column count)
            pltpu.VMEM((tile_r, 1), jnp.float32),     # b_acc (paired-column sim)
        ],
        compiler_params=pltpu.CompilerParams(
            dimension_semantics=("parallel", "arbitrary"),
            vmem_limit_bytes=64 * 1024 * 1024),
    )(feat_rows, feat_cols, inl_rows, inl_cols)

    return jnp.sum(partials[:, 0, 0]) / float(n)


def _reference_loss(f1, f2, labels, *, tau=0.2, inlier_label=1):
    """Pure-JAX f32 reference mirroring the PyTorch module (diag 0*(-inf) guarded)."""
    feats = jnp.concatenate([f1, f2], axis=0).astype(jnp.float32)
    n = feats.shape[0]
    diag = jnp.eye(n, dtype=bool)
    logits = jnp.where(diag, -jnp.inf, feats @ feats.T / tau)
    q = jax.nn.log_softmax(logits, axis=1)
    inl = (jnp.concatenate([labels, labels]) == inlier_label).astype(jnp.float32)[:, None]
    inlier_pair = inl @ inl.T
    eye = jnp.eye(n, dtype=jnp.float32)
    non_inlier = eye + jnp.roll(eye, n // 2, axis=0)
    mask = inl * inlier_pair + (1.0 - inl) * non_inlier
    mask = jnp.where(diag, 0.0, mask)
    p = mask / jnp.maximum(mask.sum(axis=1, keepdims=True), 1.0)
    pq = jnp.where(mask > 0.0, p * q, 0.0)
    return -jnp.sum(pq) / n


def _normalize(x):
    return x / jnp.linalg.norm(x, axis=1, keepdims=True)


if __name__ == "__main__":
    key = jax.random.PRNGKey(0)

    # --- small test (single tile: exercises diag / pair / padding slow path) ---
    B, D = 8, 32
    k1, k2, k3, k4, k5 = jax.random.split(key, 5)
    f1 = _normalize(jax.random.normal(k1, (B, D), dtype=jnp.float32))
    f2 = _normalize(jax.random.normal(k2, (B, D), dtype=jnp.float32))
    labels = jnp.array([1, 1, 0, 1, 0, 1, 1, 0], dtype=jnp.int32)

    loss = jax.block_until_ready(firm_loss_v2(f1, f2, labels, tau=0.2, inlier_label=1))
    ref = _reference_loss(f1, f2, labels, tau=0.2, inlier_label=1)
    assert bool(jnp.isfinite(loss)), ("non-finite loss", loss)
    assert bool(jnp.allclose(loss, ref, rtol=5e-2, atol=5e-2)), (loss, ref)

    # --- larger multi-tile test (exercises the off-band fast path too) ---
    B2, D2 = 256, 32
    f1b = _normalize(jax.random.normal(k3, (B2, D2), dtype=jnp.float32))
    f2b = _normalize(jax.random.normal(k4, (B2, D2), dtype=jnp.float32))
    labels_b = (jax.random.uniform(k5, (B2,)) < 0.7).astype(jnp.int32)

    loss2 = jax.block_until_ready(
        firm_loss_v2(f1b, f2b, labels_b, tau=0.2, inlier_label=1, tile_r=128, tile_c=128))
    ref2 = _reference_loss(f1b, f2b, labels_b, tau=0.2, inlier_label=1)
    assert bool(jnp.isfinite(loss2)), ("non-finite loss", loss2)
    assert bool(jnp.allclose(loss2, ref2, rtol=5e-2, atol=5e-2)), (loss2, ref2)

    print("KERNEL_OK")
</pallas_src>

<mosaic_0001>
module attributes {stable_mosaic.version = 11 : i64} {
  func.func @_firm_v2_kernel(%arg0: i32, %arg1: i32, %arg2: memref<16x128xbf16, #tpu.memory_space<vmem>>, %arg3: memref<128x128xbf16, #tpu.memory_space<vmem>>, %arg4: memref<16x1xf32, #tpu.memory_space<vmem>>, %arg5: memref<1x128xf32, #tpu.memory_space<vmem>>, %arg6: memref<1x1x128xf32, #tpu.memory_space<vmem>>, %arg7: memref<16x128xf32, #tpu.memory_space<vmem>>, %arg8: memref<16x128xf32, #tpu.memory_space<vmem>>, %arg9: memref<16x1xf32, #tpu.memory_space<vmem>>, %arg10: memref<16x1xf32, #tpu.memory_space<vmem>>) attributes {dimension_semantics = [#tpu.dimension_semantics<parallel>, #tpu.dimension_semantics<arbitrary>], iteration_bounds = array<i64: 1, 1>, scalar_prefetch = 0 : i64, scratch_operands = 4 : i64, tpu.core_type = #tpu.core_type<tc>, window_params = [{transform_indices = @transform_0, window_bounds = array<i64: 16, 128>}, {transform_indices = @transform_1, window_bounds = array<i64: 128, 128>}, {transform_indices = @transform_2, window_bounds = array<i64: 16, 1>}, {transform_indices = @transform_3, window_bounds = array<i64: 1, 128>}, {transform_indices = @transform_4, window_bounds = array<i64: 1, 1, 128>}]} {
    %c16_i32 = arith.constant 16 : i32
    %0 = arith.muli %arg0, %c16_i32 : i32
    %c16_i32_0 = arith.constant 16 : i32
    %1 = arith.addi %0, %c16_i32_0 : i32
    %c128_i32 = arith.constant 128 : i32
    %2 = arith.muli %arg1, %c128_i32 : i32
    %c128_i32_1 = arith.constant 128 : i32
    %3 = arith.addi %2, %c128_i32_1 : i32
    %c0_i32 = arith.constant 0 : i32
    %4 = arith.cmpi eq, %arg1, %c0_i32 : i32
    %5 = arith.extui %4 : i1 to i32
    %c0_i32_2 = arith.constant 0 : i32
    %6 = arith.cmpi ne, %5, %c0_i32_2 : i32
    scf.if %6 {
      %cst_16 = arith.constant 0.000000e+00 : f32
      %36 = vector.broadcast %cst_16 : f32 to vector<16x128xf32>
      %c0_17 = arith.constant 0 : index
      %c0_18 = arith.constant 0 : index
      %37 = vector.load %arg7[%c0_17, %c0_18] : memref<16x128xf32, #tpu.memory_space<vmem>>, vector<16x128xf32>
      tpu.vector_store %arg7[%c0_17, %c0_18], %36 {strides = array<i32>} : memref<16x128xf32, #tpu.memory_space<vmem>>, vector<16x128xf32>,
      %cst_19 = arith.constant 0.000000e+00 : f32
      %38 = vector.broadcast %cst_19 : f32 to vector<16x128xf32>
      %c0_20 = arith.constant 0 : index
      %c0_21 = arith.constant 0 : index
      %39 = vector.load %arg8[%c0_20, %c0_21] : memref<16x128xf32, #tpu.memory_space<vmem>>, vector<16x128xf32>
      tpu.vector_store %arg8[%c0_20, %c0_21], %38 {strides = array<i32>} : memref<16x128xf32, #tpu.memory_space<vmem>>, vector<16x128xf32>,
      %cst_22 = arith.constant 0.000000e+00 : f32
      %40 = vector.broadcast %cst_22 : f32 to vector<16x1xf32>
      %c0_23 = arith.constant 0 : index
      %c0_24 = arith.constant 0 : index
      %41 = vector.load %arg9[%c0_23, %c0_24] : memref<16x1xf32, #tpu.memory_space<vmem>>, vector<16x1xf32>
      tpu.vector_store %arg9[%c0_23, %c0_24], %40 {strides = array<i32>} : memref<16x1xf32, #tpu.memory_space<vmem>>, vector<16x1xf32>,
      %cst_25 = arith.constant 0.000000e+00 : f32
      %42 = vector.broadcast %cst_25 : f32 to vector<16x1xf32>
      %c0_26 = arith.constant 0 : index
      %c0_27 = arith.constant 0 : index
      %43 = vector.load %arg10[%c0_26, %c0_27] : memref<16x1xf32, #tpu.memory_space<vmem>>, vector<16x1xf32>
      tpu.vector_store %arg10[%c0_26, %c0_27], %42 {strides = array<i32>} : memref<16x1xf32, #tpu.memory_space<vmem>>, vector<16x1xf32>,
    } else {
    }
    %c0 = arith.constant 0 : index
    %c0_3 = arith.constant 0 : index
    %7 = vector.load %arg2[%c0, %c0_3] : memref<16x128xbf16, #tpu.memory_space<vmem>>, vector<16x128xbf16>
    %c0_4 = arith.constant 0 : index
    %c0_5 = arith.constant 0 : index
    %8 = vector.load %arg3[%c0_4, %c0_5] : memref<128x128xbf16, #tpu.memory_space<vmem>>, vector<128x128xbf16>
    %cst = arith.constant dense<0.000000e+00> : vector<16x128xf32>
    %9 = tpu.matmul %7, %8, %cst {dimension_numbers = #tpu.dot_dimension_numbers<[1], [0], [0], [1], [0, 0, 1, 1], [], []>} : vector<16x128xbf16>, vector<128x128xbf16>, vector<16x128xf32> -> vector<16x128xf32>
    %c0_6 = arith.constant 0 : index
    %c0_7 = arith.constant 0 : index
    %10 = vector.load %arg5[%c0_6, %c0_7] : memref<1x128xf32, #tpu.memory_space<vmem>>, vector<1x128xf32>
    %11 = arith.cmpi slt, %0, %3 : i32
    %12 = arith.cmpi slt, %2, %1 : i32
    %13 = arith.andi %11, %12 : i1
    %c8_i32 = arith.constant 8 : i32
    %14 = arith.addi %0, %c8_i32 : i32
    %15 = arith.cmpi slt, %14, %3 : i32
    %c8_i32_8 = arith.constant 8 : i32
    %16 = arith.addi %1, %c8_i32_8 : i32
    %17 = arith.cmpi slt, %2, %16 : i32
    %18 = arith.andi %15, %17 : i1
    %c8_i32_9 = arith.constant 8 : i32
    %19 = arith.subi %0, %c8_i32_9 : i32
    %20 = arith.cmpi slt, %19, %3 : i32
    %c8_i32_10 = arith.constant 8 : i32
    %21 = arith.subi %1, %c8_i32_10 : i32
    %22 = arith.cmpi slt, %2, %21 : i32
    %23 = arith.andi %20, %22 : i1
    %24 = arith.ori %18, %23 : i1
    %c16_i32_11 = arith.constant 16 : i32
    %25 = arith.cmpi sgt, %3, %c16_i32_11 : i32
    %26 = arith.ori %13, %24 : i1
    %27 = arith.ori %26, %25 : i1
    %true = arith.constant true
    %28 = arith.xori %27, %true : i1
    %29 = arith.extui %28 : i1 to i32
    %c0_i32_12 = arith.constant 0 : i32
    %30 = arith.cmpi ne, %29, %c0_i32_12 : i32
    scf.if %30 {
      %c0_16 = arith.constant 0 : index
      %c0_17 = arith.constant 0 : index
      %36 = vector.load %arg7[%c0_16, %c0_17] : memref<16x128xf32, #tpu.memory_space<vmem>>, vector<16x128xf32>
      %cst_18 = arith.constant 5.000000e+00 : f32
      %37 = vector.broadcast %cst_18 : f32 to vector<16x128xf32>
      %38 = arith.subf %9, %37 : vector<16x128xf32>
      %39 = math.exp %38 : vector<16x128xf32>
      %40 = arith.addf %36, %39 : vector<16x128xf32>
      %c0_19 = arith.constant 0 : index
      %c0_20 = arith.constant 0 : index
      %41 = vector.load %arg7[%c0_19, %c0_20] : memref<16x128xf32, #tpu.memory_space<vmem>>, vector<16x128xf32>
      tpu.vector_store %arg7[%c0_19, %c0_20], %40 {strides = array<i32>} : memref<16x128xf32, #tpu.memory_space<vmem>>, vector<16x128xf32>,
      %c0_21 = arith.constant 0 : index
      %c0_22 = arith.constant 0 : index
      %42 = vector.load %arg8[%c0_21, %c0_22] : memref<16x128xf32, #tpu.memory_space<vmem>>, vector<16x128xf32>
      %43 = vector.broadcast %10 : vector<1x128xf32> to vector<16x128xf32>
      %44 = arith.mulf %43, %9 : vector<16x128xf32>
      %45 = arith.addf %42, %44 : vector<16x128xf32>
      %c0_23 = arith.constant 0 : index
      %c0_24 = arith.constant 0 : index
      %46 = vector.load %arg8[%c0_23, %c0_24] : memref<16x128xf32, #tpu.memory_space<vmem>>, vector<16x128xf32>
      tpu.vector_store %arg8[%c0_23, %c0_24], %45 {strides = array<i32>} : memref<16x128xf32, #tpu.memory_space<vmem>>, vector<16x128xf32>,
      %c0_25 = arith.constant 0 : index
      %c0_26 = arith.constant 0 : index
      %47 = vector.load %arg9[%c0_25, %c0_26] : memref<16x1xf32, #tpu.memory_space<vmem>>, vector<16x1xf32>
      %cst_27 = arith.constant dense<0.000000e+00> : vector<1xf32>
      %48 = vector.multi_reduction <add>, %10, %cst_27 [1] : vector<1x128xf32> to vector<1xf32>
      %49 = vector.shape_cast %48 : vector<1xf32> to vector<1x1xf32>
      %50 = vector.broadcast %49 : vector<1x1xf32> to vector<16x1xf32>
      %51 = arith.addf %47, %50 : vector<16x1xf32>
      %c0_28 = arith.constant 0 : index
      %c0_29 = arith.constant 0 : index
      %52 = vector.load %arg9[%c0_28, %c0_29] : memref<16x1xf32, #tpu.memory_space<vmem>>, vector<16x1xf32>
      tpu.vector_store %arg9[%c0_28, %c0_29], %51 {strides = array<i32>} : memref<16x1xf32, #tpu.memory_space<vmem>>, vector<16x1xf32>,
    } else {
    }
    %31 = arith.extui %27 : i1 to i32
    %c0_i32_13 = arith.constant 0 : i32
    %32 = arith.cmpi ne, %31, %c0_i32_13 : i32
    scf.if %32 {
      %36 = tpu.iota {dimensions = array<i32: 0>} : vector<16x1xi32>
      %37 = vector.broadcast %0 : i32 to vector<16x1xi32>
      %38 = arith.addi %37, %36 : vector<16x1xi32>
      %39 = tpu.iota {dimensions = array<i32: 1>} : vector<1x128xi32>
      %40 = vector.broadcast %2 : i32 to vector<1x128xi32>
      %41 = arith.addi %40, %39 : vector<1x128xi32>
      %42 = vector.broadcast %38 : vector<16x1xi32> to vector<16x128xi32>
      %43 = vector.broadcast %41 : vector<1x128xi32> to vector<16x128xi32>
      %44 = arith.cmpi eq, %42, %43 : vector<16x128xi32>
      %c16_i32_16 = arith.constant 16 : i32
      %45 = vector.broadcast %c16_i32_16 : i32 to vector<1x128xi32>
      %46 = arith.cmpi slt, %41, %45 : vector<1x128xi32>
      %cst_17 = arith.constant dense<true> : vector<1x128xi1>
      %47 = arith.xori %46, %cst_17 : vector<1x128xi1>
      %48 = vector.broadcast %47 : vector<1x128xi1> to vector<16x128xi1>
      %49 = arith.ori %44, %48 : vector<16x128xi1>
      %cst_18 = arith.constant -1.000000e+30 : f32
      %50 = vector.broadcast %cst_18 : f32 to vector<16x128xf32>
      %51 = arith.select %49, %50, %9 : vector<16x128xi1>, vector<16x128xf32>
      %c0_19 = arith.constant 0 : index
      %c0_20 = arith.constant 0 : index
      %52 = vector.load %arg7[%c0_19, %c0_20] : memref<16x128xf32, #tpu.memory_space<vmem>>, vector<16x128xf32>
      %cst_21 = arith.constant 5.000000e+00 : f32
      %53 = vector.broadcast %cst_21 : f32 to vector<16x128xf32>
      %54 = arith.subf %51, %53 : vector<16x128xf32>
      %55 = math.exp %54 : vector<16x128xf32>
      %56 = arith.addf %52, %55 : vector<16x128xf32>
      %c0_22 = arith.constant 0 : index
      %c0_23 = arith.constant 0 : index
      %57 = vector.load %arg7[%c0_22, %c0_23] : memref<16x128xf32, #tpu.memory_space<vmem>>, vector<16x128xf32>
      tpu.vector_store %arg7[%c0_22, %c0_23], %56 {strides = array<i32>} : memref<16x128xf32, #tpu.memory_space<vmem>>, vector<16x128xf32>,
      %cst_24 = arith.constant dense<true> : vector<16x128xi1>
      %58 = arith.xori %49, %cst_24 : vector<16x128xi1>
      %59 = arith.extui %58 : vector<16x128xi1> to vector<16x128xi32>
      %60 = arith.sitofp %59 : vector<16x128xi32> to vector<16x128xf32>
      %cst_25 = arith.constant 0.000000e+00 : f32
      %61 = vector.broadcast %cst_25 : f32 to vector<16x128xf32>
      %62 = arith.select %49, %61, %9 : vector<16x128xi1>, vector<16x128xf32>
      %c0_26 = arith.constant 0 : index
      %c0_27 = arith.constant 0 : index
      %63 = vector.load %arg8[%c0_26, %c0_27] : memref<16x128xf32, #tpu.memory_space<vmem>>, vector<16x128xf32>
      %64 = vector.broadcast %10 : vector<1x128xf32> to vector<16x128xf32>
      %65 = arith.mulf %64, %62 : vector<16x128xf32>
      %66 = arith.addf %63, %65 : vector<16x128xf32>
      %c0_28 = arith.constant 0 : index
      %c0_29 = arith.constant 0 : index
      %67 = vector.load %arg8[%c0_28, %c0_29] : memref<16x128xf32, #tpu.memory_space<vmem>>, vector<16x128xf32>
      tpu.vector_store %arg8[%c0_28, %c0_29], %66 {strides = array<i32>} : memref<16x128xf32, #tpu.memory_space<vmem>>, vector<16x128xf32>,
      %c0_30 = arith.constant 0 : index
      %c0_31 = arith.constant 0 : index
      %68 = vector.load %arg9[%c0_30, %c0_31] : memref<16x1xf32, #tpu.memory_space<vmem>>, vector<16x1xf32>
      %69 = vector.broadcast %10 : vector<1x128xf32> to vector<16x128xf32>
      %70 = arith.mulf %69, %60 : vector<16x128xf32>
      %cst_32 = arith.constant dense<0.000000e+00> : vector<16xf32>
      %71 = vector.multi_reduction <add>, %70, %cst_32 [1] : vector<16x128xf32> to vector<16xf32>
      %72 = vector.shape_cast %71 : vector<16xf32> to vector<16x1xf32>
      %73 = arith.addf %68, %72 : vector<16x1xf32>
      %c0_33 = arith.constant 0 : index
      %c0_34 = arith.constant 0 : index
      %74 = vector.load %arg9[%c0_33, %c0_34] : memref<16x1xf32, #tpu.memory_space<vmem>>, vector<16x1xf32>
      tpu.vector_store %arg9[%c0_33, %c0_34], %73 {strides = array<i32>} : memref<16x1xf32, #tpu.memory_space<vmem>>, vector<16x1xf32>,
      %c8_i32_35 = arith.constant 8 : i32
      %75 = vector.broadcast %c8_i32_35 : i32 to vector<16x1xi32>
      %76 = arith.cmpi slt, %38, %75 : vector<16x1xi32>
      %c8_i32_36 = arith.constant 8 : i32
      %77 = vector.broadcast %c8_i32_36 : i32 to vector<16x1xi32>
      %78 = arith.addi %38, %77 : vector<16x1xi32>
      %c8_i32_37 = arith.constant 8 : i32
      %79 = vector.broadcast %c8_i32_37 : i32 to vector<16x1xi32>
      %80 = arith.subi %38, %79 : vector<16x1xi32>
      %81 = arith.select %76, %78, %80 : vector<16x1xi1>, vector<16x1xi32>
      %82 = vector.broadcast %81 : vector<16x1xi32> to vector<16x128xi32>
      %83 = vector.broadcast %41 : vector<1x128xi32> to vector<16x128xi32>
      %84 = arith.cmpi eq, %82, %83 : vector<16x128xi32>
      %85 = vector.broadcast %46 : vector<1x128xi1> to vector<16x128xi1>
      %86 = arith.andi %84, %85 : vector<16x128xi1>
      %87 = arith.extui %86 : vector<16x128xi1> to vector<16x128xi32>
      %88 = arith.sitofp %87 : vector<16x128xi32> to vector<16x128xf32>
      %c0_38 = arith.constant 0 : index
      %c0_39 = arith.constant 0 : index
      %89 = vector.load %arg10[%c0_38, %c0_39] : memref<16x1xf32, #tpu.memory_space<vmem>>, vector<16x1xf32>
      %90 = arith.mulf %88, %62 : vector<16x128xf32>
      %cst_40 = arith.constant dense<0.000000e+00> : vector<16xf32>
      %91 = vector.multi_reduction <add>, %90, %cst_40 [1] : vector<16x128xf32> to vector<16xf32>
      %92 = vector.shape_cast %91 : vector<16xf32> to vector<16x1xf32>
      %93 = arith.addf %89, %92 : vector<16x1xf32>
      %c0_41 = arith.constant 0 : index
      %c0_42 = arith.constant 0 : index
      %94 = vector.load %arg10[%c0_41, %c0_42] : memref<16x1xf32, #tpu.memory_space<vmem>>, vector<16x1xf32>
      tpu.vector_store %arg10[%c0_41, %c0_42], %93 {strides = array<i32>} : memref<16x1xf32, #tpu.memory_space<vmem>>, vector<16x1xf32>,
    } else {
    }
    %c0_i32_14 = arith.constant 0 : i32
    %33 = arith.cmpi eq, %arg1, %c0_i32_14 : i32
    %34 = arith.extui %33 : i1 to i32
    %c0_i32_15 = arith.constant 0 : i32
    %35 = arith.cmpi ne, %34, %c0_i32_15 : i32
    scf.if %35 {
      %36 = tpu.iota {dimensions = array<i32: 0>} : vector<16x1xi32>
      %37 = vector.broadcast %0 : i32 to vector<16x1xi32>
      %38 = arith.addi %37, %36 : vector<16x1xi32>
      %c16_i32_16 = arith.constant 16 : i32
      %39 = vector.broadcast %c16_i32_16 : i32 to vector<16x1xi32>
      %40 = arith.cmpi slt, %38, %39 : vector<16x1xi32>
      %41 = arith.extui %40 : vector<16x1xi1> to vector<16x1xi32>
      %42 = arith.sitofp %41 : vector<16x1xi32> to vector<16x1xf32>
      %c0_17 = arith.constant 0 : index
      %c0_18 = arith.constant 0 : index
      %43 = vector.load %arg7[%c0_17, %c0_18] : memref<16x128xf32, #tpu.memory_space<vmem>>, vector<16x128xf32>
      %cst_19 = arith.constant dense<0.000000e+00> : vector<16xf32>
      %44 = vector.multi_reduction <add>, %43, %cst_19 [1] : vector<16x128xf32> to vector<16xf32>
      %45 = vector.shape_cast %44 : vector<16xf32> to vector<16x1xf32>
      %46 = math.log %45 : vector<16x1xf32>
      %cst_20 = arith.constant 5.000000e+00 : f32
      %47 = vector.broadcast %cst_20 : f32 to vector<16x1xf32>
      %48 = arith.addf %47, %46 : vector<16x1xf32>
      %c0_21 = arith.constant 0 : index
      %c0_22 = arith.constant 0 : index
      %49 = vector.load %arg8[%c0_21, %c0_22] : memref<16x128xf32, #tpu.memory_space<vmem>>, vector<16x128xf32>
      %cst_23 = arith.constant dense<0.000000e+00> : vector<16xf32>
      %50 = vector.multi_reduction <add>, %49, %cst_23 [1] : vector<16x128xf32> to vector<16xf32>
      %51 = vector.shape_cast %50 : vector<16xf32> to vector<16x1xf32>
      %c0_24 = arith.constant 0 : index
      %c0_25 = arith.constant 0 : index
      %52 = vector.load %arg4[%c0_24, %c0_25] : memref<16x1xf32, #tpu.memory_space<vmem>>, vector<16x1xf32>
      %53 = arith.mulf %52, %51 : vector<16x1xf32>
      %cst_26 = arith.constant 1.000000e+00 : f32
      %54 = vector.broadcast %cst_26 : f32 to vector<16x1xf32>
      %55 = arith.subf %54, %52 : vector<16x1xf32>
      %c0_27 = arith.constant 0 : index
      %c0_28 = arith.constant 0 : index
      %56 = vector.load %arg10[%c0_27, %c0_28] : memref<16x1xf32, #tpu.memory_space<vmem>>, vector<16x1xf32>
      %57 = arith.mulf %55, %56 : vector<16x1xf32>
      %58 = arith.addf %53, %57 : vector<16x1xf32>
      %c0_29 = arith.constant 0 : index
      %c0_30 = arith.constant 0 : index
      %59 = vector.load %arg9[%c0_29, %c0_30] : memref<16x1xf32, #tpu.memory_space<vmem>>, vector<16x1xf32>
      %60 = arith.mulf %52, %59 : vector<16x1xf32>
      %cst_31 = arith.constant 1.000000e+00 : f32
      %61 = vector.broadcast %cst_31 : f32 to vector<16x1xf32>
      %62 = arith.subf %61, %52 : vector<16x1xf32>
      %63 = arith.addf %60, %62 : vector<16x1xf32>
      %cst_32 = arith.constant 1.000000e+00 : f32
      %64 = vector.broadcast %cst_32 : f32 to vector<16x1xf32>
      %65 = arith.maximumf %63, %64 : vector<16x1xf32>
      %66 = arith.mulf %63, %48 : vector<16x1xf32>
      %67 = arith.subf %58, %66 : vector<16x1xf32>
      %cst_33 = arith.constant 0.000000e+00 : f32
      %68 = vector.broadcast %cst_33 : f32 to vector<16x1xf32>
      %69 = arith.subf %68, %67 : vector<16x1xf32>
      %70 = arith.divf %69, %65 : vector<16x1xf32>
      %71 = arith.mulf %70, %42 : vector<16x1xf32>
      %cst_34 = arith.constant dense<0.000000e+00> : vector<1xf32>
      %72 = vector.multi_reduction <add>, %71, %cst_34 [0] : vector<16x1xf32> to vector<1xf32>
      %73 = vector.shape_cast %72 : vector<1xf32> to vector<1x1xf32>
      %74 = vector.shape_cast %73 : vector<1x1xf32> to vector<1x1xf32>
      %75 = vector.broadcast %74 : vector<1x1xf32> to vector<1x128xf32>
      %c0_35 = arith.constant 0 : index
      %c0_36 = arith.constant 0 : index
      %c0_37 = arith.constant 0 : index
      %76 = vector.load %arg6[%c0_35, %c0_36, %c0_37] : memref<1x1x128xf32, #tpu.memory_space<vmem>>, vector<1x1x128xf32>
      %77 = vector.shape_cast %76 : vector<1x1x128xf32> to vector<1x128xf32>
      %78 = vector.shape_cast %75 : vector<1x128xf32> to vector<1x1x128xf32>
      tpu.vector_store %arg6[%c0_35, %c0_36, %c0_37], %78 {strides = array<i32>} : memref<1x1x128xf32, #tpu.memory_space<vmem>>, vector<1x1x128xf32>,
    } else {
    }
    return
  }
  func.func @transform_0(%arg0: i32, %arg1: i32) -> (i32, i32) {
    %c0_i32 = arith.constant 0 : i32
    %c0_i32_0 = arith.constant 0 : i32
    return %arg0, %c0_i32 : i32, i32
  }
  func.func @transform_1(%arg0: i32, %arg1: i32) -> (i32, i32) {
    %c0_i32 = arith.constant 0 : i32
    %c0_i32_0 = arith.constant 0 : i32
    return %c0_i32, %arg1 : i32, i32
  }
  func.func @transform_2(%arg0: i32, %arg1: i32) -> (i32, i32) {
    %c0_i32 = arith.constant 0 : i32
    %c0_i32_0 = arith.constant 0 : i32
    return %arg0, %c0_i32 : i32, i32
  }
  func.func @transform_3(%arg0: i32, %arg1: i32) -> (i32, i32) {
    %c0_i32 = arith.constant 0 : i32
    %c0_i32_0 = arith.constant 0 : i32
    return %c0_i32, %arg1 : i32, i32
  }
  func.func @transform_4(%arg0: i32, %arg1: i32) -> (i32, i32, i32) {
    %c0_i32 = arith.constant 0 : i32
    %c0_i32_0 = arith.constant 0 : i32
    %c0_i32_1 = arith.constant 0 : i32
    return %arg0, %c0_i32, %c0_i32_0 : i32, i32, i32
  }
}

</mosaic_0001>

<bundles_post_ra>
// kernel: tpu_custom_call.1
= control target key start
LH: loop header
LB: loop body
LE: loop exit
PB: predicated region body
PF: predicated region fallthrough
CT: control target
= control target key end

     0   :  { %9 = vsyncpa [#allocation7], 0  ;;  %s642_s0 = inlined_call_operand.vmem [shape: bf16[16,128], index: 0, kind: input, shape index: {}]   ;;  %s643_s1 = inlined_call_operand.hbm [shape: bf16[128,128], index: 1, kind: input, shape index: {}]   ;;  %s644_s2 = inlined_call_operand.vmem [shape: f32[16,1], index: 2, kind: input, shape index: {}]   ;;  %s645_s3 = inlined_call_operand.vmem [shape: f32[1,128], index: 3, kind: input, shape index: {}]   ;;  %s646_s4 = inlined_call_operand.hbm [shape: f32[1,1,128], index: 4, kind: output, shape index: {}]  }
   0x1   :  { %10 = vsyncpa [#allocation8], 0  ;;  %s17_s17 = sshll.u32 %s643_s1, 4  ;;  %s545_s18 = smov [#allocation6]   ;;  %s18_s17 = int_to_ptr.hbm [resolvable:$true] %s17_s17 }
   0x2   :  { %s19_s19 = sshll.u32 %s545_s18, 4  ;;  %s546_s20 = smov 64   ;;  %s20_s19 = int_to_ptr.vmem [resolvable:$true] %s19_s19 }
   0x3   :  { %s547_s21 = smov 4  }
   0x4   :  { %25 = dma.hbm_to_vmem [thread:$0]  %s18_s17, 1024, %s20_s19, [#allocation7], %s546_s20, %s546_s20, %s547_s21  }
   0x5   :  { %541 = dma.done.wait [#allocation7], 1024  }
   0x6   :  { %542 = vsyncadd [#allocation7], 4294966272  ;;  %v470_v0 = vld [vmem:[#allocation6 + $0x38] sm:$0xff]  ;;  %v160_v1 = vlaneseq  ;;  %v469_v2 = vld [vmem:[#allocation6 + $0x30] sm:$0xff]  ;;  %vm548_vm2 = vmmov 1   ;;  %v549_v9 = vmov 0.0  }
   0x7   :  { %123 = vmatpush.bf16.msra.mxu0 %v470_v0  ;;  %v468_v6 = vld [vmem:[#allocation6 + $0x28] sm:$0xff]  ;;  %v584_v7 = vld [vmem:[%s645_s3] ss:$0 sm:$0xff]  ;;  %v466_v15 = vld [vmem:[#allocation6 + $0x18] sm:$0xff]  ;;  %vm46_vm9 = vcmask 7168   ;;  %v550_v61 = vmov 0  }
   0x8   :  { %v161_v3 = vshrl.u32 %v160_v1, 7  ;;  %v167_v4 = vand.u32 127, %v160_v1  ;;  %v467_v12 = vld [vmem:[#allocation6 + $0x20] sm:$0xff]  ;;  %v465_v17 = vld [vmem:[#allocation6 + $0x10] sm:$0xff]  ;;  %v464_v18 = vld [vmem:[#allocation6 + $0x8] sm:$0xff]  ;;  %47 = vst.msk [vmem:[#allocation4] sm:$0xff] %vm46_vm9, %v549_v9  ;;  %478 = vset.pattern.permute.xlu2 %v550_v61  ;;  %479 = vset.pattern.permute.xlu0 %v550_v61 }
   0x9   :  { %v463_v19 = vld [vmem:[#allocation6] sm:$0xff]  ;;  %48 = vst.msk [vmem:[#allocation4 + $0x8] sm:$0xff] %vm46_vm9, %v549_v9  ;;  %v326_v50 = vld [vmem:[%s644_s2 + $0x8] sm:$0xff]  ;;  %s406_s30 = sshll.u32 %s646_s4, 4  ;;  %s407_s30 = int_to_ptr.hbm [resolvable:$true] %s406_s30 }
   0xa   :  { %vm170_vm0 = vcmp.eq.s32.totalorder %v161_v3, %v167_v4  ;;  %vm172_vm1 = vcmp.lt.s32.totalorder %v167_v4, 16  ;;  %v162_v5 = vadd.s32 8, %v161_v3  ;;  %v462_v20 = vld [vmem:[%s642_s0] sm:$0xff]  ;;  %49 = vst.msk [vmem:[#allocation5] sm:$0xff] %vm46_vm9, %v549_v9  ;;  %v330_v52 = vsub.f32 1.0, %v326_v50 }
   0xb   :  { %124 = vmatpush.bf16.msra.mxu0 %v469_v2  ;;  %vm173_vm3 = vmxor %vm172_vm1, %vm548_vm2  ;;  %50 = vst.msk [vmem:[#allocation5 + $0x8] sm:$0xff] %vm46_vm9, %v549_v9  ;;  %v325_v46 = vld [vmem:[%s644_s2] sm:$0xff]  ;;  %s551_s2 = smov [#allocation9]  }
   0xc   :  { %vm586_vm4 = vmor %vm170_vm0, %vm173_vm3  ;;  %vm171_vm5 = vcmp.eq.s32.totalorder %v162_v5, %v167_v4  ;;  %v457_v22 = vadd.s32 4294967288, %v162_v5  ;;  %v329_v48 = vsub.f32 1.0, %v325_v46  ;;  %s404_s27 = sshll.u32 %s551_s2, 4  ;;  %s405_s27 = int_to_ptr.vmem [resolvable:$true] %s404_s27 }
   0xd   :  { %vm192_vm6 = vmxor %vm586_vm4, %vm548_vm2 }
   0xe   :  { %v454_v10 = vsel %vm192_vm6, 1.0, %v549_v9  ;;  %vm593_vm7 = vmor %vm171_vm5, %vm173_vm3  ;;  %vm233_vm11 = vcmp.eq.s32.totalorder %v457_v22, %v167_v4 }
   0xf   :  { %125 = vmatpush.bf16.msra.mxu0 %v468_v6  ;;  %v213_v13 = vmul.f32 %v584_v7, %v454_v10  ;;  %vm193_vm8 = vmxor %vm593_vm7, %vm548_vm2  ;;  %v211_v23 = vld [vmem:[#allocation4] sm:$0xff] }
  0x10   :  { %v455_v14 = vsel %vm193_vm8, 1.0, %v549_v9  ;;  %vm236_vm10 = vmand %vm171_vm5, %vm172_vm1  ;;  %v212_v26 = vld [vmem:[#allocation4 + $0x8] sm:$0xff] }
  0x11   :  { %215 = vadd.xlane.f32.xlu0 %v213_v13  ;;  %v214_v16 = vmul.f32 %v584_v7, %v455_v14  ;;  %v458_v27 = vsel %vm236_vm10, 1.0, %v549_v9  ;;  %vm237_vm12 = vmand %vm233_vm11, %vm172_vm1  ;;  %v242_v55 = vld [vmem:[#allocation5] sm:$0xff] }
  0x12   :  { %v459_v36 = vsel %vm237_vm12, 1.0, %v549_v9  ;;  %v243_v62 = vld [vmem:[#allocation5 + $0x8] sm:$0xff] }
  0x13   :  { %126 = vmatpush.bf16.msra.mxu0 %v467_v12 }
  0x17   :  { %127 = vmatpush.bf16.msra.mxu0 %v466_v15 }
  0x19   :  { %217 = vadd.xlane.f32.xlu0 %v214_v16 }
  0x1b   :  { %128 = vmatpush.bf16.msra.mxu0 %v465_v17 }
  0x1f   :  { %129 = vmatpush.bf16.msra.mxu0 %v464_v18 }
  0x23   :  { %130 = vmatpush.bf16.msra.mxu0 %v463_v19 }
  0x26   :  { %131 = vmatmul.bf16.vlgmr.msra.gmra.mxu0 %v462_v20 }
  0x84   :  { %v216_v21 = vpop.xlane.xlu0 %215 }
  0x85   :  { %v219_v25 = vadd.f32 %v216_v21, %v211_v23 }
  0x87   :  { %222 = vst.msk [vmem:[#allocation4] sm:$0xff] %vm46_vm9, %v219_v25 }
  0x8c   :  { %v218_v24 = vpop.xlane.xlu0 %217 }
  0x8d   :  { %v220_v28 = vadd.f32 %v218_v24, %v212_v26 }
  0x8e   :  { %v337_v47 = vld [vmem:[#allocation4] sm:$0xff] }
  0x8f   :  { %223 = vst.msk [vmem:[#allocation4 + $0x8] sm:$0xff] %vm46_vm9, %v220_v28  ;;  %v339_v49 = vmul.f32 %v337_v47, %v325_v46 }
  0x91   :  { %v341_v54 = vadd.f32 %v339_v49, %v329_v48 }
  0x93   :  { %v343_v57 = vmax.f32 %v341_v54, 1.0 }
  0x95   :  { %vm356_vm13 = vweird.f32 %v343_v57  ;;  %v360_v23 = vand.u32 2147483647, %v343_v57  ;;  %v362_v24 = vand.u32 2147483648, %v343_v57 }
  0x96   :  { %v338_v51 = vld [vmem:[#allocation4 + $0x8] sm:$0xff] }
  0x97   :  { %v340_v53 = vmul.f32 %v338_v51, %v326_v50  ;;  %vm361_vm3 = vcmp.eq.f32.partialorder %v360_v23, 8.507059e+37 }
  0x99   :  { %v342_v56 = vadd.f32 %v340_v53, %v330_v52 }
  0x9b   :  { %v344_v60 = vmax.f32 %v342_v56, 1.0 }
  0x9d   :  { %vm371_vm15 = vweird.f32 %v344_v60 }
  0xa3   :  { %v132_v29 = vpop.f32.mrf.mxu0 }
  0xa4   :  { %v178_v30 = vsel %vm586_vm4, -1e+30, %v132_v29  ;;  %v198_v31 = vsel %vm586_vm4, 0.0, %v132_v29 }
  0xa5   :  { %v452_v32 = vadd.f32 -5.0, %v178_v30  ;;  %v244_v33 = vmul.f32 %v458_v27, %v198_v31  ;;  %v205_v34 = vmul.f32 %v584_v7, %v198_v31  ;;  %v377_v30 = vand.u32 2147483648, %v344_v60 }
  0xa7   :  { %246 = vadd.xlane.f32.xlu1 %v244_v33  ;;  %321 = vadd.xlane.f32.xlu0 %v205_v34  ;;  %v184_v35 = vmul.f32 1.442695, %v452_v32  ;;  %v375_v34 = vand.u32 2147483647, %v344_v60 }
  0xa9   :  { %481 = vpow2.f32 %v184_v35  ;;  %vm376_vm4 = vcmp.eq.f32.partialorder %v375_v34, 8.507059e+37 }
  0xab   :  { %v134_v37 = vpop.f32.mrf.mxu0 }
  0xac   :  { %v179_v38 = vsel %vm593_vm7, -1e+30, %v134_v37  ;;  %v199_v39 = vsel %vm593_vm7, 0.0, %v134_v37 }
  0xad   :  { %v453_v40 = vadd.f32 -5.0, %v179_v38  ;;  %v245_v41 = vmul.f32 %v459_v36, %v199_v39  ;;  %v206_v44 = vmul.f32 %v584_v7, %v199_v39  ;;  %v363_v36 = vor.u32 1.1754944e-38, %v362_v24 }
  0xaf   :  { %v482_v42 = vpop.eup %481  ;;  %v186_v43 = vmul.f32 1.442695, %v453_v40  ;;  %248 = vadd.xlane.f32.xlu1 %v245_v41  ;;  %v378_v40 = vor.u32 1.1754944e-38, %v377_v30 }
  0xb0   :  { %309 = vadd.xlane.f32.xlu2 %v482_v42 }
  0xb1   :  { %483 = vpow2.f32 %v186_v43 }
  0xb2   :  { %485 = vrcp.f32 %v343_v57 }
  0xb3   :  { %487 = vrcp.f32 %v344_v60 }
  0xb7   :  { %v484_v45 = vpop.eup %483  ;;  %323 = vadd.xlane.f32.xlu1 %v206_v44 }
  0xb8   :  { %311 = vadd.xlane.f32.xlu2 %v484_v45  ;;  %v486_v0 = vpop.eup %485 }
  0xb9   :  { %v488_v3 = vpop.eup %487  ;;  %v352_v4 = vmul.f32 %v486_v0, %v343_v57  ;;  %vm357_vm14 = vweird.f32 %v486_v0 }
  0xba   :  { %v367_v5 = vmul.f32 %v488_v3, %v344_v60  ;;  %vm631_vm0 = vmor %vm356_vm13, %vm357_vm14  ;;  %vm372_vm1 = vweird.f32 %v488_v3 }
  0xbb   :  { %v353_v8 = vsub.f32 1.0, %v352_v4  ;;  %vm373_vm2 = vmor %vm371_vm15, %vm372_vm1 }
  0xbc   :  { %v368_v14 = vsub.f32 1.0, %v367_v5 }
  0xbd   :  { %v354_v15 = vmul.f32 %v486_v0, %v353_v8 }
  0xbe   :  { %v369_v20 = vmul.f32 %v488_v3, %v368_v14 }
  0xbf   :  { %v355_v22 = vadd.f32 %v486_v0, %v354_v15 }
  0xc0   :  { %v370_v33 = vadd.f32 %v488_v3, %v369_v20 }
  0xc1   :  { %v359_v35 = vsel %vm631_vm0, %v486_v0, %v355_v22 }
  0xc2   :  { %v374_v42 = vsel %vm373_vm2, %v488_v3, %v370_v33  ;;  %v364_v43 = vsel %vm361_vm3, %v363_v36, %v359_v35 }
 0x11a   :  { %v247_v58 = vpop.xlane.xlu1 %246  ;;  %v322_v11 = vpop.xlane.xlu0 %321 }
 0x11b   :  { %v250_v59 = vadd.f32 %v247_v58, %v242_v55  ;;  %v327_v16 = vmul.f32 %v325_v46, %v322_v11  ;;  %v379_v46 = vsel %vm376_vm4, %v378_v40, %v374_v42 }
 0x11d   :  { %252 = vst.msk [vmem:[#allocation5] sm:$0xff] %vm46_vm9, %v250_v59 }
 0x122   :  { %v249_v63 = vpop.xlane.xlu1 %248 }
 0x123   :  { %v251_v1 = vadd.f32 %v249_v63, %v243_v62  ;;  %v310_v2 = vpop.xlane.xlu2 %309 }
 0x124   :  { %489 = vlog2.f32 %v310_v2  ;;  %v331_v7 = vld [vmem:[#allocation5] sm:$0xff] }
 0x125   :  { %253 = vst.msk [vmem:[#allocation5 + $0x8] sm:$0xff] %vm46_vm9, %v251_v1  ;;  %v333_v12 = vmul.f32 %v331_v7, %v329_v48 }
 0x127   :  { %v335_v19 = vadd.f32 %v333_v12, %v327_v16 }
 0x12a   :  { %v490_v6 = vpop.eup %489  ;;  %v324_v25 = vpop.xlane.xlu1 %323 }
 0x12b   :  { %v314_v9 = vmul.f32 0.6931472, %v490_v6  ;;  %v312_v10 = vpop.xlane.xlu2 %311  ;;  %v328_v31 = vmul.f32 %v326_v50, %v324_v25 }
 0x12c   :  { %491 = vlog2.f32 %v312_v10  ;;  %v332_v18 = vld [vmem:[#allocation5 + $0x8] sm:$0xff] }
 0x12d   :  { %v317_v13 = vadd.f32 5.0, %v314_v9  ;;  %v334_v28 = vmul.f32 %v332_v18, %v330_v52 }
 0x12f   :  { %v345_v17 = vmul.f32 %v341_v54, %v317_v13  ;;  %v336_v38 = vadd.f32 %v334_v28, %v328_v31 }
 0x131   :  { %v347_v26 = vsub.f32 %v335_v19, %v345_v17 }
 0x132   :  { %v492_v21 = vpop.eup %491 }
 0x133   :  { %v316_v29 = vmul.f32 0.6931472, %v492_v21  ;;  %v349_v37 = vsub.f32 0.0, %v347_v26 }
 0x135   :  { %v318_v32 = vadd.f32 5.0, %v316_v29  ;;  %v365_v44 = vmul.f32 %v364_v43, %v349_v37 }
 0x137   :  { %v346_v39 = vmul.f32 %v342_v56, %v318_v32  ;;  %v384_v48 = vsel %vm46_vm9, %v365_v44, 0.0 }
 0x139   :  { %v348_v41 = vsub.f32 %v336_v38, %v346_v39 }
 0x13b   :  { %v350_v45 = vsub.f32 0.0, %v348_v41 }
 0x13d   :  { %v380_v47 = vmul.f32 %v379_v46, %v350_v45 }
 0x13f   :  { %v385_v49 = vsel %vm46_vm9, %v380_v47, 0.0 }
 0x140   :  { %v386_v50 = vadd.f32 %v385_v49, %v384_v48 }
 0x142   :  { %v387_v51 = vrot.slane %v386_v50, 4 }
 0x144   :  { %v388_v52 = vadd.f32 %v387_v51, %v386_v50 }
 0x146   :  { %v389_v53 = vrot.slane %v388_v52, 2 }
 0x148   :  { %v390_v54 = vadd.f32 %v389_v53, %v388_v52 }
 0x14a   :  { %v391_v55 = vrot.slane %v390_v54, 1 }
 0x14c   :  { %v392_v56 = vadd.f32 %v391_v55, %v390_v54 }
 0x14e   :  { %395 = vperm.xlu2 %478, %v392_v56  }
 0x1a8   :  { %v396_v57 = vpop.permute.xlu2 %395 }
 0x1a9   :  { %398 = vst [vmem:[#allocation9] sm:$0x1] %v396_v57 }
 0x1aa   :  { %409 = dma.vmem_to_hbm [thread:$0]  %s405_s27, 16, %s407_s30, [#allocation8]  }
 0x1ab   :  { %543 = dma.done.wait [#allocation8], 16  }
 0x1ac   :  { %544 = vsyncadd [#allocation8], 4294967280 }
 0x1ad   :  { %414 = vsyncpa [#allocation7], 1 }
 0x1ae   :  { %415 = vsyncpa [#allocation8], 1 }

</bundles_post_ra>
